<compile_context>
chip_gen: v6e
topology: v6e:2x2x1
jax: 0.10.0
libtpu: 0.0.40
codegen_flags: <defaults>
</compile_context>

<pallas_src>
import functools

import jax
import jax.numpy as jnp
from jax.experimental import pallas as pl
from jax.experimental.pallas import tpu as pltpu


def _round_up(n, m):
    return ((n + m - 1) // m) * m


def sink_cat_kernel(x_ref, *rest, F, B, tB, nblk, bpc, split_y, need_mask):
    """One (core-split, batch-block) step of sum(relu(cat([x,x],1)) * y)."""
    if split_y:
        y_lo_ref, y_hi_ref, o_ref, acc_ref = rest
    else:
        y_ref, o_ref, acc_ref = rest

    c = pl.program_id(0)   # core-split axis ("parallel")
    i = pl.program_id(1)   # per-core reduction axis ("arbitrary")

    # Per-core accumulator init on its first reduction step.
    @pl.when(i == 0)
    def _():
        acc_ref[...] = jnp.zeros_like(acc_ref)

    # relu / y-half add in the input dtype (bf16 VALU exists on v6e/v7x);
    # multiply-accumulate in f32.
    rx = jnp.maximum(x_ref[...], 0)                       # relu(x), (tB, F)
    if split_y:
        ysum = y_lo_ref[...] + y_hi_ref[...]              # lane-aligned halves
    else:
        y = y_ref[...]
        ysum = y[:, :F] + y[:, F:]                        # cheap for F < 128
    prod = rx.astype(jnp.float32) * ysum.astype(jnp.float32)   # (tB, F) f32

    if need_mask:
        blk = c * bpc + i     # un-clamped logical block index
        # Only the last real block (partial rows) or a phantom block (clamped
        # duplicate past nblk when nblk is odd) needs masking.
        @pl.when(blk < nblk - 1)
        def _():
            acc_ref[...] += jnp.sum(prod, axis=0, keepdims=True)

        @pl.when(blk >= nblk - 1)
        def _():
            rows = blk * tB + jax.lax.broadcasted_iota(jnp.int32, prod.shape, 0)
            masked = jnp.where(rows < B, prod, 0.0)
            acc_ref[...] += jnp.sum(masked, axis=0, keepdims=True)
    else:
        acc_ref[...] += jnp.sum(prod, axis=0, keepdims=True)

    # Emit this core's per-lane partial once; the final cross-lane / cross-core
    # collapse to a scalar happens in the wrapper (off the per-step crit path).
    @pl.when(i == pl.num_programs(1) - 1)
    def _():
        o_ref[...] = acc_ref[...].reshape(o_ref.shape)


def _vmem_config():
    """(tile budget, scoped-vmem limit) in bytes, sized per TPU generation."""
    cap = None
    get_info = getattr(pltpu, "get_tpu_info", None)
    if get_info is not None:
        try:
            cap = getattr(get_info(), "vmem_capacity_bytes", None)
        except Exception:
            cap = None
    if cap is not None and cap >= 100 * 1024 * 1024:
        # v5e / v6e: 128 MiB physical VMEM -> use it.
        return 56 << 20, 100 << 20
    # v7x (64 MiB physical) or unknown: stay under the 64 MiB floor.
    return 24 << 20, 48 << 20


def _choose_tile_rows(B, F, itemsize, vmem_budget_bytes, max_rows=None):
    """Batch-tile rows tB such that the double-buffered x+y tiles (with
    128-lane padding) fit the VMEM budget; rounded to the dtype sublane pack."""
    F_pad = _round_up(F, 128)                      # lane padding of each block
    row_mult = 8 * max(1, 4 // max(1, itemsize))   # 8 f32 / 16 bf16 / 32 int8
    # double-buffered: x row (F_pad) + y row (2 * F_pad)
    bytes_per_row = 2 * 3 * F_pad * itemsize
    tB_max = max(row_mult, (vmem_budget_bytes // bytes_per_row) // row_mult * row_mult)
    tB_max = min(tB_max, 1 << 16)
    if max_rows is not None:
        tB_max = max(row_mult, min(tB_max, _round_up(max_rows, row_mult)))
    if B <= tB_max:
        if B >= 2 * row_mult:
            # Two blocks so both v7x TensorCores get a full DMA stream.
            return _round_up((B + 1) // 2, row_mult)
        return B                                   # tiny input: one full tile
    return tB_max


def sink_cat_two_inputs(x, y, *, max_rows_per_tile=None):
    """x: (B, F), y: (B, 2F) -> scalar f32 == sum(relu(cat([x, x], 1)) * y)."""
    B, F = x.shape
    assert y.shape == (B, 2 * F), "y must broadcast against cat((x, x), dim=1)"

    vmem_budget, vmem_limit = _vmem_config()
    itemsize = max(jnp.dtype(x.dtype).itemsize, jnp.dtype(y.dtype).itemsize)
    tB = _choose_tile_rows(B, F, itemsize, vmem_budget, max_rows_per_tile)

    nblk = pl.cdiv(B, tB)                   # real batch blocks
    num_splits = 2 if nblk >= 2 else 1      # leading "parallel" axis -> v7x TCs
    bpc = pl.cdiv(nblk, num_splits)         # reduction steps per core
    need_mask = (B % tB != 0) or (num_splits * bpc != nblk)
    split_y = (F % 128 == 0)                # lane-aligned y-half split via BlockSpec

    def blk_idx(c, i):
        # Clamp phantom blocks (possible when nblk is odd) into range; their
        # contribution is masked to zero inside the kernel.
        return jnp.minimum(c * bpc + i, nblk - 1)

    in_specs = [pl.BlockSpec((tB, F), lambda c, i: (blk_idx(c, i), 0))]     # x tile
    if split_y:
        in_specs += [
            pl.BlockSpec((tB, F), lambda c, i: (blk_idx(c, i), 0)),        # y[:, :F]
            pl.BlockSpec((tB, F), lambda c, i: (blk_idx(c, i), 1)),        # y[:, F:]
        ]
        operands = (x, y, y)
    else:
        in_specs += [pl.BlockSpec((tB, 2 * F), lambda c, i: (blk_idx(c, i), 0))]
        operands = (x, y)

    kernel = functools.partial(
        sink_cat_kernel, F=F, B=B, tB=tB, nblk=nblk, bpc=bpc,
        split_y=split_y, need_mask=need_mask)

    out = pl.pallas_call(
        kernel,
        out_shape=jax.ShapeDtypeStruct((num_splits, 1, F), jnp.float32),
        grid_spec=pltpu.PrefetchScalarGridSpec(
            num_scalar_prefetch=0,
            grid=(num_splits, bpc),
            in_specs=in_specs,
            out_specs=pl.BlockSpec((1, 1, F), lambda c, i: (c, 0, 0)),
            scratch_shapes=[pltpu.VMEM((1, F), jnp.float32)],   # per-lane f32 acc
        ),
        compiler_params=pltpu.CompilerParams(
            dimension_semantics=("parallel", "arbitrary"),
            vmem_limit_bytes=vmem_limit,
        ),
    )(*operands)
    # Per-core per-lane partials -> scalar (done in XLA, off the kernel path).
    return jnp.sum(out)


def _reference(x, y):
    return jnp.sum(jnp.maximum(jnp.concatenate([x, x], axis=1), 0.0) * y)


if __name__ == "__main__":
    # Module implies in_features=2 with batch=3: x (3, 2); y matches cat -> (3, 4).
    B, F = 3, 2
    kx, ky = jax.random.split(jax.random.PRNGKey(0))
    x = jax.random.normal(kx, (B, F), dtype=jnp.float32)
    y = jax.random.normal(ky, (B, 2 * F), dtype=jnp.float32)
    result = jax.block_until_ready(sink_cat_two_inputs(x, y))
    ref = _reference(x, y)
    assert jnp.allclose(result, ref, rtol=1e-6, atol=1e-6), (result, ref)

    # Core-split + partial-tile mask path (joint-y, F < 128).
    k2x, k2y = jax.random.split(jax.random.PRNGKey(1))
    x2 = jax.random.normal(k2x, (5000, 8), dtype=jnp.float32)
    y2 = jax.random.normal(k2y, (5000, 16), dtype=jnp.float32)
    r2 = jax.block_until_ready(sink_cat_two_inputs(x2, y2))
    assert jnp.allclose(r2, _reference(x2, y2), rtol=1e-4, atol=1e-2)

    # Lane-aligned split-y BlockSpec path (F multiple of 128) + mask.
    k3x, k3y = jax.random.split(jax.random.PRNGKey(2))
    x3 = jax.random.normal(k3x, (600, 128), dtype=jnp.float32)
    y3 = jax.random.normal(k3y, (600, 256), dtype=jnp.float32)
    r3 = jax.block_until_ready(sink_cat_two_inputs(x3, y3))
    assert jnp.allclose(r3, _reference(x3, y3), rtol=1e-4, atol=1e-2)

    # Multi-step per-core reduction + phantom-block clamp (forced small tiles).
    k4x, k4y = jax.random.split(jax.random.PRNGKey(3))
    x4 = jax.random.normal(k4x, (1100, 8), dtype=jnp.float32)
    y4 = jax.random.normal(k4y, (1100, 16), dtype=jnp.float32)
    r4 = jax.block_until_ready(sink_cat_two_inputs(x4, y4, max_rows_per_tile=128))
    assert jnp.allclose(r4, _reference(x4, y4), rtol=1e-4, atol=1e-2)

    print("KERNEL_OK")
</pallas_src>

<mosaic_0001>
module attributes {stable_mosaic.version = 11 : i64} {
  func.func @sink_cat_kernel(%arg0: i32, %arg1: i32, %arg2: memref<3x2xf32, #tpu.memory_space<vmem>>, %arg3: memref<3x4xf32, #tpu.memory_space<vmem>>, %arg4: memref<1x1x2xf32, #tpu.memory_space<vmem>>, %arg5: memref<1x2xf32, #tpu.memory_space<vmem>>) attributes {dimension_semantics = [#tpu.dimension_semantics<parallel>, #tpu.dimension_semantics<arbitrary>], iteration_bounds = array<i64: 1, 1>, scalar_prefetch = 0 : i64, scratch_operands = 1 : i64, tpu.core_type = #tpu.core_type<tc>, window_params = [{transform_indices = @transform_0, window_bounds = array<i64: 3, 2>}, {transform_indices = @transform_1, window_bounds = array<i64: 3, 4>}, {transform_indices = @transform_2, window_bounds = array<i64: 1, 1, 2>}]} {
    %c0_i32 = arith.constant 0 : i32
    %0 = arith.cmpi eq, %arg1, %c0_i32 : i32
    %1 = arith.extui %0 : i1 to i32
    %c0_i32_0 = arith.constant 0 : i32
    %2 = arith.cmpi ne, %1, %c0_i32_0 : i32
    scf.if %2 {
      %cst_11 = arith.constant 0.000000e+00 : f32
      %19 = vector.broadcast %cst_11 : f32 to vector<1x2xf32>
      %c0_12 = arith.constant 0 : index
      %c0_13 = arith.constant 0 : index
      %20 = vector.load %arg5[%c0_12, %c0_13] : memref<1x2xf32, #tpu.memory_space<vmem>>, vector<1x2xf32>
      tpu.vector_store %arg5[%c0_12, %c0_13], %19 {strides = array<i32>} : memref<1x2xf32, #tpu.memory_space<vmem>>, vector<1x2xf32>,
    } else {
    }
    %c0 = arith.constant 0 : index
    %c0_1 = arith.constant 0 : index
    %3 = vector.load %arg2[%c0, %c0_1] : memref<3x2xf32, #tpu.memory_space<vmem>>, vector<3x2xf32>
    %cst = arith.constant 0.000000e+00 : f32
    %4 = vector.broadcast %cst : f32 to vector<3x2xf32>
    %5 = arith.maximumf %3, %4 : vector<3x2xf32>
    %c0_2 = arith.constant 0 : index
    %c0_3 = arith.constant 0 : index
    %6 = vector.load %arg3[%c0_2, %c0_3] : memref<3x4xf32, #tpu.memory_space<vmem>>, vector<3x4xf32>
    %7 = vector.extract_strided_slice %6 {offsets = [0, 0], sizes = [3, 2], strides = [1, 1]} : vector<3x4xf32> to vector<3x2xf32>
    %8 = vector.extract_strided_slice %6 {offsets = [0, 2], sizes = [3, 2], strides = [1, 1]} : vector<3x4xf32> to vector<3x2xf32>
    %9 = arith.addf %7, %8 : vector<3x2xf32>
    %10 = arith.mulf %5, %9 : vector<3x2xf32>
    %c0_4 = arith.constant 0 : index
    %c0_5 = arith.constant 0 : index
    %11 = vector.load %arg5[%c0_4, %c0_5] : memref<1x2xf32, #tpu.memory_space<vmem>>, vector<1x2xf32>
    %cst_6 = arith.constant dense<0.000000e+00> : vector<2xf32>
    %12 = vector.multi_reduction <add>, %10, %cst_6 [0] : vector<3x2xf32> to vector<2xf32>
    %13 = vector.shape_cast %12 : vector<2xf32> to vector<1x2xf32>
    %14 = arith.addf %11, %13 : vector<1x2xf32>
    %c0_7 = arith.constant 0 : index
    %c0_8 = arith.constant 0 : index
    %15 = vector.load %arg5[%c0_7, %c0_8] : memref<1x2xf32, #tpu.memory_space<vmem>>, vector<1x2xf32>
    tpu.vector_store %arg5[%c0_7, %c0_8], %14 {strides = array<i32>} : memref<1x2xf32, #tpu.memory_space<vmem>>, vector<1x2xf32>,
    %c0_i32_9 = arith.constant 0 : i32
    %16 = arith.cmpi eq, %arg1, %c0_i32_9 : i32
    %17 = arith.extui %16 : i1 to i32
    %c0_i32_10 = arith.constant 0 : i32
    %18 = arith.cmpi ne, %17, %c0_i32_10 : i32
    scf.if %18 {
      %c0_11 = arith.constant 0 : index
      %c0_12 = arith.constant 0 : index
      %19 = vector.load %arg5[%c0_11, %c0_12] : memref<1x2xf32, #tpu.memory_space<vmem>>, vector<1x2xf32>
      %20 = vector.shape_cast %19 : vector<1x2xf32> to vector<1x1x2xf32>
      %c0_13 = arith.constant 0 : index
      %c0_14 = arith.constant 0 : index
      %c0_15 = arith.constant 0 : index
      %21 = vector.load %arg4[%c0_13, %c0_14, %c0_15] : memref<1x1x2xf32, #tpu.memory_space<vmem>>, vector<1x1x2xf32>
      tpu.vector_store %arg4[%c0_13, %c0_14, %c0_15], %20 {strides = array<i32>} : memref<1x1x2xf32, #tpu.memory_space<vmem>>, vector<1x1x2xf32>,
    } else {
    }
    return
  }
  func.func @transform_0(%arg0: i32, %arg1: i32) -> (i32, i32) {
    %c1_i32 = arith.constant 1 : i32
    %0 = arith.muli %arg0, %c1_i32 : i32
    %1 = arith.addi %0, %arg1 : i32
    %c0_i32 = arith.constant 0 : i32
    %2 = arith.minsi %1, %c0_i32 : i32
    %c0_i32_0 = arith.constant 0 : i32
    %c0_i32_1 = arith.constant 0 : i32
    return %2, %c0_i32_0 : i32, i32
  }
  func.func @transform_1(%arg0: i32, %arg1: i32) -> (i32, i32) {
    %c1_i32 = arith.constant 1 : i32
    %0 = arith.muli %arg0, %c1_i32 : i32
    %1 = arith.addi %0, %arg1 : i32
    %c0_i32 = arith.constant 0 : i32
    %2 = arith.minsi %1, %c0_i32 : i32
    %c0_i32_0 = arith.constant 0 : i32
    %c0_i32_1 = arith.constant 0 : i32
    return %2, %c0_i32_0 : i32, i32
  }
  func.func @transform_2(%arg0: i32, %arg1: i32) -> (i32, i32, i32) {
    %c0_i32 = arith.constant 0 : i32
    %c0_i32_0 = arith.constant 0 : i32
    %c0_i32_1 = arith.constant 0 : i32
    return %arg0, %c0_i32, %c0_i32_0 : i32, i32, i32
  }
}

</mosaic_0001>

<bundles_post_ra>
// kernel: tpu_custom_call.1
= control target key start
LH: loop header
LB: loop body
LE: loop exit
PB: predicated region body
PF: predicated region fallthrough
CT: control target
= control target key end

     0   :  { %s149_s11 = smov 126   ;;  %s179_s0 = inlined_call_operand.vmem [shape: f32[3,2], index: 0, kind: input, shape index: {}]   ;;  %s180_s1 = inlined_call_operand.vmem [shape: f32[3,4], index: 1, kind: input, shape index: {}]   ;;  %s181_s2 = inlined_call_operand.hbm [shape: f32[1,1,2], index: 2, kind: output, shape index: {}]  }
   0x1   :  { %v74_v0 = vld [vmem:[%s180_s1] sm:$0x7] }
   0x2   :  { %76 = vrot.lane.b32.xlu0 %v74_v0, %s149_s11 }
   0x3   :  { %7 = vsyncpa [#allocation4], 0  ;;  %vm70_vm0 = vcmask 8192   ;;  %v150_v1 = vmov 0.0   ;;  %v72_v2 = vld [vmem:[%s179_s0] sm:$0x7] }
   0x4   :  { %71 = vst.msk [vmem:[#allocation2] sm:$0x1] %vm70_vm0, %v150_v1  ;;  %v73_v3 = vmax.f32 %v72_v2, 0.0  ;;  %vm82_vm1 = vcmask 10240   ;;  %s151_s1 = smov [#allocation3]  }
   0x5   :  { %s104_s14 = sshll.u32 %s151_s1, 4  ;;  %s105_s14 = int_to_ptr.vmem [resolvable:$true] %s104_s14 }
   0x6   :  { %s127_s0 = scalar_lea.vmem %s105_s14, 16  ;;  %s131_s15 = scalar_lea.vmem %s105_s14, 32 }
   0x7   :  { %p128_p0 = scmp.ne.s32.totalorder %s105_s14, %s127_s0  ;;  %p132_p1 = scmp.lt.s32.totalorder %s105_s14, %s105_s14 }
   0x8   :  { %p133_p2 = scmp.lt.s32.totalorder %s131_s15, %s127_s0 }
   0xa   :  { %p134_p3 = por %p133_p2, %p132_p1 }
   0xb   :  { %v81_v13 = vld [vmem:[#allocation2] sm:$0x1] }
   0xc   :  { %p135_p4 = pnand %p134_p3, %p128_p0 }
  0x74   :  { %v77_v4 = vpop.permute.xlu0 %76 }
  0x75   :  { %v79_v5 = vadd.f32 %v77_v4, %v74_v0 }
  0x77   :  { %v80_v6 = vmul.f32 %v79_v5, %v73_v3 }
  0x79   :  { %v83_v7 = vsel %vm82_vm1, %v80_v6, 0.0 }
  0x7a   :  { %v84_v8 = vrot.slane %v83_v7, 4 }
  0x7c   :  { %v85_v9 = vadd.f32 %v84_v8, %v83_v7 }
  0x7e   :  { %v86_v10 = vrot.slane %v85_v9, 2 }
  0x80   :  { %v87_v11 = vadd.f32 %v86_v10, %v85_v9 }
  0x82   :  { %v88_v12 = vrot.slane %v87_v11, 1 }
  0x84   :  { %v89_v14 = vadd.f32 %v88_v12, %v87_v11 }
  0x86   :  { %v90_v15 = vadd.f32 %v89_v14, %v81_v13 }
  0x88   :  { %92 = vst.msk [vmem:[#allocation2] sm:$0x1] %vm70_vm0, %v90_v15 }
  0x8f   :  { %v96_v16 = vld [vmem:[#allocation2] sm:$0x1] }
  0x90   :  { %97 = vst.msk [vmem:[#allocation3] sm:$0x1] %vm70_vm0, %v96_v16 }
  0x91   :  { %138 = shalt.err (!%p135_p4)
}
  0x92   :  { %107 = dma.vmem_to_hbm [thread:$0]  %s105_s14, 16, %s181_s2, [#allocation4]  }
  0x93   :  { %147 = dma.done.wait [#allocation4], 16  }
  0x94   :  { %148 = vsyncadd [#allocation4], 4294967280 }
  0x95   :  { %111 = vsyncpa [#allocation4], 1 }

</bundles_post_ra>
